<compile_context>
chip_gen: v6e
topology: v6e:2x2x1
jax: 0.10.0
libtpu: 0.0.40
codegen_flags: <defaults>
</compile_context>

<pallas_src>
import jax
import jax.numpy as jnp
from jax.experimental import pallas as pl
from jax.experimental.pallas import tpu as pltpu


def _round_up(x, m):
    return ((x + m - 1) // m) * m


def linear_kernel(x_ref, w1_ref, b1_ref, w2_ref, b2_ref, o_ref):
    # x_ref: (bb, C, ts)  feature-major activation slab of [B, C, S]
    # o_ref: (bb, ts, F)  row-major output slab of [B, S, F]
    w1 = w1_ref[...]            # (M, C)  VMEM-resident across the grid
    b1 = b1_ref[...]            # (M, 1)
    w2 = w2_ref[...]            # (F, M)
    b2 = b2_ref[...]            # (F, 1)
    bb = x_ref.shape[0]

    def body(i, carry):
        x = x_ref[i]                                                   # (C, ts)
        h = jnp.dot(w1, x, preferred_element_type=jnp.float32) + b1    # (M, ts)
        o = jnp.dot(w2, h, preferred_element_type=jnp.float32) + b2    # (F, ts)
        # Tiny (F, ts) -> (ts, F) transpose on the XLU: lets us write the
        # final row-major layout directly (no post-kernel HBM transpose pass).
        o_ref[i] = o.T.astype(o_ref.dtype)
        return carry

    jax.lax.fori_loop(0, bb, body, 0, unroll=True)


def linear_forward(inp, w1, b1, w2, b2, *, ts=2048):
    """Pallas forward of the PyTorch Linear module.

    inp: [B, C, H, W] float32 (NCHW)
    w1:  [n_middle, C],  b1: [n_middle]      (PyTorch nn.Linear layout)
    w2:  [n_final, n_middle],  b2: [n_final]
    returns: [B*H*W, n_final] with rows in (b, h, w) order, identical to
             permute(0, 2, 3, 1).reshape(-1, C) ordering.
    """
    B, C, H, W = inp.shape
    M, c_in = w1.shape
    F, m_in = w2.shape
    assert c_in == C and m_in == M
    S = H * W

    # ---- Tiling -------------------------------------------------------------
    # Spatial tile: multiple of 128 (lane-dense loads), NO HBM padding needed.
    ts = min(ts, _round_up(S, 128))
    if B == 1 and S > 128:
        # v7x has 2 TensorCores; keep >= 2 "parallel" blocks so neither idles.
        ts = min(ts, _round_up(pl.cdiv(S, 2), 128))
    ns = pl.cdiv(S, ts)

    # Batch blocking: when one spatial tile covers a whole image, process
    # several images per grid step (longer contiguous DMAs, fewer grid steps),
    # while keeping >= 2 grid blocks and a bounded per-step VMEM slab.
    bb = 1
    if ns == 1 and B > 1:
        target = max(1, min(B // 2, (4 << 20) // (4 * (C + F) * ts)))
        for d in range(target, 0, -1):
            if B % d == 0:
                bb = d
                break
    nb = pl.cdiv(B, bb)

    x = inp.reshape(B, C, S)   # zero-copy; no NCHW->NHWC transpose in HBM

    # ---- Explicit VMEM budget (v5e scoped default is only 16 MiB) -----------
    resident = 4 * (M * C + M + F * M + F)          # weights + biases
    per_step = 4 * bb * ts * (C + F)                # one input + one output block
    scratch = 4 * ts * (M + F)                      # in-kernel h / o intermediates
    vmem_limit = int(min(48 << 20,
                         max(16 << 20, 2 * (2 * per_step + resident + scratch))))

    out = pl.pallas_call(
        linear_kernel,
        out_shape=jax.ShapeDtypeStruct((B, S, F), jnp.float32),
        grid_spec=pltpu.PrefetchScalarGridSpec(
            num_scalar_prefetch=0,
            grid=(nb, ns),
            in_specs=[
                pl.BlockSpec((bb, C, ts), lambda b, s: (b, 0, s)),   # activations
                pl.BlockSpec((M, C), lambda b, s: (0, 0)),           # W1 (resident)
                pl.BlockSpec((M, 1), lambda b, s: (0, 0)),           # b1 (column)
                pl.BlockSpec((F, M), lambda b, s: (0, 0)),           # W2 (resident)
                pl.BlockSpec((F, 1), lambda b, s: (0, 0)),           # b2 (column)
            ],
            out_specs=pl.BlockSpec((bb, ts, F), lambda b, s: (b, s, 0)),
        ),
        compiler_params=pltpu.CompilerParams(
            dimension_semantics=("parallel", "parallel"),
            vmem_limit_bytes=vmem_limit),
    )(x, w1, b1.reshape(M, 1), w2, b2.reshape(F, 1))

    # Zero-copy: rows already in (b, h, w) order, features already last.
    return out.reshape(B * S, F)


def reference_forward(inp, w1, b1, w2, b2):
    """Pure-JAX mirror of the PyTorch forward (same default matmul precision)."""
    B, C, H, W = inp.shape
    x = jnp.transpose(inp, (0, 2, 3, 1)).reshape(-1, C)
    h = jnp.dot(x, w1.T) + b1
    o = jnp.dot(h, w2.T) + b2
    return o.reshape(-1, w2.shape[0])


if __name__ == "__main__":
    B, C, H, W = 2, 4, 16, 16           # batch=2, features(C)=4, spatial=16
    N_MIDDLE, N_FINAL = 32, 8

    key = jax.random.PRNGKey(0)
    k_inp, k_w1, k_b1, k_w2, k_b2 = jax.random.split(key, 5)
    inp = jax.random.normal(k_inp, (B, C, H, W), jnp.float32)
    w1 = 0.1 * jax.random.normal(k_w1, (N_MIDDLE, C), jnp.float32)
    b1 = 0.1 * jax.random.normal(k_b1, (N_MIDDLE,), jnp.float32)
    w2 = 0.1 * jax.random.normal(k_w2, (N_FINAL, N_MIDDLE), jnp.float32)
    b2 = 0.1 * jax.random.normal(k_b2, (N_FINAL,), jnp.float32)

    out = linear_forward(inp, w1, b1, w2, b2)
    jax.block_until_ready(out)

    ref = reference_forward(inp, w1, b1, w2, b2)
    assert out.shape == (B * H * W, N_FINAL), out.shape
    max_err = float(jnp.max(jnp.abs(out - ref)))
    assert jnp.allclose(out, ref, atol=1e-3, rtol=1e-3), max_err

    print("KERNEL_OK")
</pallas_src>

<mosaic_0001>
module attributes {stable_mosaic.version = 11 : i64} {
  func.func @linear_kernel(%arg0: i32, %arg1: i32, %arg2: memref<1x4x256xf32, #tpu.memory_space<vmem>>, %arg3: memref<32x4xf32, #tpu.memory_space<vmem>>, %arg4: memref<32x1xf32, #tpu.memory_space<vmem>>, %arg5: memref<8x32xf32, #tpu.memory_space<vmem>>, %arg6: memref<8x1xf32, #tpu.memory_space<vmem>>, %arg7: memref<1x256x8xf32, #tpu.memory_space<vmem>>) attributes {dimension_semantics = [#tpu.dimension_semantics<parallel>, #tpu.dimension_semantics<parallel>], iteration_bounds = array<i64: 2, 1>, scalar_prefetch = 0 : i64, scratch_operands = 0 : i64, tpu.core_type = #tpu.core_type<tc>, window_params = [{transform_indices = @transform_0, window_bounds = array<i64: 1, 4, 256>}, {pipeline_mode = #tpu.pipeline_mode<synchronous>, transform_indices = @transform_1, window_bounds = array<i64: 32, 4>}, {pipeline_mode = #tpu.pipeline_mode<synchronous>, transform_indices = @transform_2, window_bounds = array<i64: 32, 1>}, {pipeline_mode = #tpu.pipeline_mode<synchronous>, transform_indices = @transform_3, window_bounds = array<i64: 8, 32>}, {pipeline_mode = #tpu.pipeline_mode<synchronous>, transform_indices = @transform_4, window_bounds = array<i64: 8, 1>}, {transform_indices = @transform_5, window_bounds = array<i64: 1, 256, 8>}]} {
    %c0 = arith.constant 0 : index
    %c0_0 = arith.constant 0 : index
    %0 = vector.load %arg3[%c0, %c0_0] : memref<32x4xf32, #tpu.memory_space<vmem>>, vector<32x4xf32>
    %c0_1 = arith.constant 0 : index
    %c0_2 = arith.constant 0 : index
    %1 = vector.load %arg4[%c0_1, %c0_2] : memref<32x1xf32, #tpu.memory_space<vmem>>, vector<32x1xf32>
    %c0_3 = arith.constant 0 : index
    %c0_4 = arith.constant 0 : index
    %2 = vector.load %arg5[%c0_3, %c0_4] : memref<8x32xf32, #tpu.memory_space<vmem>>, vector<8x32xf32>
    %c0_5 = arith.constant 0 : index
    %c0_6 = arith.constant 0 : index
    %3 = vector.load %arg6[%c0_5, %c0_6] : memref<8x1xf32, #tpu.memory_space<vmem>>, vector<8x1xf32>
    %c0_i32 = arith.constant 0 : i32
    %4 = arith.index_cast %c0_i32 : i32 to index
    %c0_7 = arith.constant 0 : index
    %c0_8 = arith.constant 0 : index
    %5 = vector.load %arg2[%4, %c0_7, %c0_8] : memref<1x4x256xf32, #tpu.memory_space<vmem>>, vector<1x4x256xf32>
    %6 = vector.shape_cast %5 : vector<1x4x256xf32> to vector<4x256xf32>
    %cst = arith.constant dense<0.000000e+00> : vector<32x256xf32>
    %7 = tpu.matmul %0, %6, %cst {dimension_numbers = #tpu.dot_dimension_numbers<[1], [0], [0], [1], [0, 0, 1, 1], [], []>} : vector<32x4xf32>, vector<4x256xf32>, vector<32x256xf32> -> vector<32x256xf32>
    %8 = vector.broadcast %1 : vector<32x1xf32> to vector<32x256xf32>
    %9 = arith.addf %7, %8 : vector<32x256xf32>
    %cst_9 = arith.constant dense<0.000000e+00> : vector<8x256xf32>
    %10 = tpu.matmul %2, %9, %cst_9 {dimension_numbers = #tpu.dot_dimension_numbers<[1], [0], [0], [1], [0, 0, 1, 1], [], []>} : vector<8x32xf32>, vector<32x256xf32>, vector<8x256xf32> -> vector<8x256xf32>
    %11 = vector.broadcast %3 : vector<8x1xf32> to vector<8x256xf32>
    %12 = arith.addf %10, %11 : vector<8x256xf32>
    %13 = tpu.transpose %12, [1, 0] : vector<8x256xf32> -> vector<256x8xf32>
    %14 = arith.index_cast %c0_i32 : i32 to index
    %c0_10 = arith.constant 0 : index
    %c0_11 = arith.constant 0 : index
    %15 = vector.load %arg7[%14, %c0_10, %c0_11] : memref<1x256x8xf32, #tpu.memory_space<vmem>>, vector<1x256x8xf32>
    %16 = vector.shape_cast %15 : vector<1x256x8xf32> to vector<256x8xf32>
    %17 = vector.shape_cast %13 : vector<256x8xf32> to vector<1x256x8xf32>
    tpu.vector_store %arg7[%14, %c0_10, %c0_11], %17 {strides = array<i32>} : memref<1x256x8xf32, #tpu.memory_space<vmem>>, vector<1x256x8xf32>,
    %c1_i32 = arith.constant 1 : i32
    return
  }
  func.func @transform_0(%arg0: i32, %arg1: i32) -> (i32, i32, i32) {
    %c0_i32 = arith.constant 0 : i32
    %c0_i32_0 = arith.constant 0 : i32
    return %arg0, %c0_i32, %arg1 : i32, i32, i32
  }
  func.func @transform_1(%arg0: i32, %arg1: i32) -> (i32, i32) {
    %c0_i32 = arith.constant 0 : i32
    %c0_i32_0 = arith.constant 0 : i32
    %c0_i32_1 = arith.constant 0 : i32
    return %c0_i32, %c0_i32_0 : i32, i32
  }
  func.func @transform_2(%arg0: i32, %arg1: i32) -> (i32, i32) {
    %c0_i32 = arith.constant 0 : i32
    %c0_i32_0 = arith.constant 0 : i32
    %c0_i32_1 = arith.constant 0 : i32
    return %c0_i32, %c0_i32_0 : i32, i32
  }
  func.func @transform_3(%arg0: i32, %arg1: i32) -> (i32, i32) {
    %c0_i32 = arith.constant 0 : i32
    %c0_i32_0 = arith.constant 0 : i32
    %c0_i32_1 = arith.constant 0 : i32
    return %c0_i32, %c0_i32_0 : i32, i32
  }
  func.func @transform_4(%arg0: i32, %arg1: i32) -> (i32, i32) {
    %c0_i32 = arith.constant 0 : i32
    %c0_i32_0 = arith.constant 0 : i32
    %c0_i32_1 = arith.constant 0 : i32
    return %c0_i32, %c0_i32_0 : i32, i32
  }
  func.func @transform_5(%arg0: i32, %arg1: i32) -> (i32, i32, i32) {
    %c0_i32 = arith.constant 0 : i32
    %c0_i32_0 = arith.constant 0 : i32
    return %arg0, %arg1, %c0_i32 : i32, i32, i32
  }
}

</mosaic_0001>

<bundles_post_ra>
// kernel: tpu_custom_call.1
= control target key start
LH: loop header
LB: loop body
LE: loop exit
PB: predicated region body
PF: predicated region fallthrough
CT: control target
= control target key end

     0   :  { %s773_s18 = smov 0   ;;  %s775_s19 = smov 0   ;;  %s906_s0 = inlined_call_operand.vmem [shape: f32[2,4,256], index: 0, kind: input, shape index: {}]   ;;  %s907_s1 = inlined_call_operand.vmem [shape: f32[32,4], index: 1, kind: input, shape index: {}]   ;;  %s908_s2 = inlined_call_operand.vmem [shape: f32[32,1], index: 2, kind: input, shape index: {}]   ;;  %s909_s3 = inlined_call_operand.vmem [shape: f32[8,32], index: 3, kind: input, shape index: {}]   ;;  %s910_s4 = inlined_call_operand.vmem [shape: f32[8,1], index: 4, kind: input, shape index: {}]   ;;  %s911_s5 = inlined_call_operand.vmem [shape: f32[2,256,8], index: 5, kind: output, shape index: {}]  }
   0x1   :  { %s777_s20 = smov 0  }
   0x2 LB: > { %s27_s21 = sadd.s32 1, %s735_s19  ;;  %p672_p0 = scmp.ge.s32.totalorder %s739_s20, 1  ;;  %s739_s20 = sphi %s777_s20, %s15_s20   ;;  %s735_s19 = sphi %s775_s19, %s913_s19   ;;  %s731_s18 = sphi %s773_s18, %s912_s18  }
   0x3   : > { %p29_p1 = scmp.ge.s32.totalorder %s27_s21, 2  ;;  %p208_p2 = scmp.lt.s32.totalorder %s739_s20, 3 }
   0x5   : > { %s915_s21 = smov (%p29_p1, %s27_s21), 0  ;;  %p209_p3 = pnand %p672_p0, %p208_p2 }
   0x6   : > { %p245_p4 = scmp.lt.s32.totalorder (!%p209_p3), %s731_s18, 1 }
   0x7   : > { %212 = sbr.rel (%p209_p3) target bundleno = 621 (0x26d), region = 40 }
   0xc   : > { %v741_v0 = vmov 0.0   ;;  %v269_v1 = vld [vmem:[%s908_s2 + $0x8] sm:$0xff]  ;;  %s917_s18 = smov (!%p245_p4, %s731_s18), 1  ;;  %v742_v2 = vmov 0   ;;  %v271_v3 = vld [vmem:[%s908_s2 + $0x18] sm:$0xff]  ;;  %v268_v4 = vld [vmem:[%s908_s2] sm:$0xff] }
   0xd   : > { %379 = vmatprep.mubr.f32.mxu0 %v741_v0  ;;  %477 = vmatprep.mubr.f32.mxu1 %v741_v0  ;;  %s686_s26 = sshll.u32 %s917_s18, 3  ;;  %v270_v5 = vld [vmem:[%s908_s2 + $0x10] sm:$0xff]  ;;  %vm310_vm0 = vcmask 1043456   ;;  %v264_v8 = vld [vmem:[%s907_s1] sm:$0xff]  ;;  %vm297_vm1 = vcmask 31744   ;;  %v265_v10 = vld [vmem:[%s907_s1 + $0x8] sm:$0xff] }
   0xe   : > { %715 = vset.pattern.permute.xlu1 %v742_v2  ;;  %714 = vset.pattern.permute.xlu0 %v742_v2  ;;  %s252_s8 = scalar_lea.vmem %s906_s0, %s686_s26  ;;  %v273_v9 = vld [vmem:[%s910_s4] sm:$0xff]  ;;  %v266_v11 = vld [vmem:[%s907_s1 + $0x10] sm:$0xff]  ;;  %v267_v12 = vld [vmem:[%s907_s1 + $0x18] sm:$0xff]  ;;  %vm409_vm2 = vcmask 261120   ;;  %s687_s25 = sshll.u32 %s917_s18, 8  ;;  %vm548_vm3 = vcmask 64512  }
   0xf   : > { %282 = vperm.xlu1 %715, %v269_v1   ;;  %292 = vperm.xlu0 %714, %v271_v3   ;;  %v274_v6 = vld [vmem:[%s252_s8] sm:$0xff]  ;;  %s831_s28 = scalar_lea.vmem %s911_s5, %s687_s25 }
  0x10   : > { %v296_v7 = vcombine.high %v274_v6, %v274_v6  ;;  %v272_v33 = vld [vmem:[%s909_s3] sm:$0xff] }
  0x12   : > { %677 = vmatprep.subr.msk.mxu0 %vm310_vm0, %v296_v7 }
  0x13   : > { %277 = vperm.xlu1 %715, %v268_v4   ;;  %287 = vperm.xlu0 %714, %v270_v5  }
  0x14   : > { %678 = vmatpush1.msk.msra.mxu0 %vm310_vm0, %v274_v6 }
  0x15   : > { %679 = vmatmul.mubr.msk.f32.vlgmr.msra.gmra.mxu0 %vm297_vm1, %v264_v8 }
  0x16   : > { %385 = vmatprep.mubr.f32.mxu0 %v741_v0 }
  0x17   : > { %406 = vperm.xlu0 %714, %v273_v9  }
  0x19   : > { %680 = vmatmul.mubr.msk.f32.gmra.mxu0 %vm297_vm1, %v265_v10 }
  0x1a   : > { %391 = vmatprep.mubr.f32.mxu0 %v741_v0 }
  0x1d   : > { %681 = vmatmul.mubr.msk.f32.gmra.mxu0 %vm297_vm1, %v266_v11 }
  0x1e   : > { %397 = vmatprep.mubr.f32.mxu0 %v741_v0 }
  0x21   : > { %682 = vmatmul.mubr.msk.f32.gmra.mxu0 %vm297_vm1, %v267_v12 }
  0x8a   : > { %v293_v18 = vpop.permute.xlu0 %292  ;;  %v283_v21 = vpop.permute.xlu1 %282 }
  0x8e   : > { %v288_v23 = vpop.permute.xlu0 %287  ;;  %v278_v28 = vpop.permute.xlu1 %277 }
  0x92   : > { %v407_v34 = vpop.permute.xlu0 %406 }
  0xd5   : > { %v381_v13 = vpop.f32.mrf.mxu0 }
  0xd6   : > { %v382_v32 = vadd.f32 %v381_v13, %v278_v28 }
  0xd7   : > { %v383_v14 = vpop.f32.mrf.mxu0 }
  0xd8   : > { %v384_v31 = vadd.f32 %v383_v14, %v278_v28 }
  0xd9   : > { %v387_v15 = vpop.f32.mrf.mxu0 }
  0xda   : > { %v388_v30 = vadd.f32 %v387_v15, %v283_v21 }
  0xdb   : > { %v389_v16 = vpop.f32.mrf.mxu0 }
  0xdc   : > { %v390_v29 = vadd.f32 %v389_v16, %v283_v21 }
  0xdd   : > { %v393_v17 = vpop.f32.mrf.mxu0 }
  0xde   : > { %v394_v27 = vadd.f32 %v393_v17, %v288_v23 }
  0xdf   : > { %v395_v19 = vpop.f32.mrf.mxu0 }
  0xe0   : > { %v396_v26 = vadd.f32 %v395_v19, %v288_v23 }
  0xe1   : > { %v399_v20 = vpop.f32.mrf.mxu0 }
  0xe2   : > { %v400_v25 = vadd.f32 %v399_v20, %v293_v18 }
  0xe3   : > { %v401_v22 = vpop.f32.mrf.mxu0 }
  0xe4   : > { %v402_v24 = vadd.f32 %v401_v22, %v293_v18 }
  0xe6   : > { %437 = vmatprep.subr.mxu1 %v402_v24 }
  0xe7   : > { %438 = vmatpush1.msra.mxu1 %v400_v25 }
  0xe8   : > { %439 = vmatprep.subr.mxu1 %v396_v26 }
  0xe9   : > { %440 = vmatpush1.msra.mxu1 %v394_v27 }
  0xea   : > { %441 = vmatprep.subr.mxu1 %v390_v29 }
  0xeb   : > { %442 = vmatpush1.msra.mxu1 %v388_v30 }
  0xec   : > { %443 = vmatprep.subr.mxu1 %v384_v31 }
  0xed   : > { %444 = vmatpush1.msra.mxu1 %v382_v32 }
  0xee   : > { %683 = vmatmul.mubr.msk.f32.vlgmr.msra.gmra.mxu1 %vm409_vm2, %v272_v33 }
 0x1ae   : > { %v479_v35 = vpop.f32.mrf.mxu1 }
 0x1af   : > { %v480_v36 = vadd.f32 %v479_v35, %v407_v34 }
 0x1b0   : > { %v481_v37 = vpop.f32.mrf.mxu1 }
 0x1b1   : > { %v482_v38 = vadd.f32 %v481_v37, %v407_v34  ;;  %484 = vxpose.xlu1.b32.start.end [1/1] (short) %v480_v36, 128 }
 0x1b3   : > { %516 = vxpose.xlu0.b32.start.end [1/1] (short) %v482_v38, 128 }
 0x22d   : > { %v500_v39 = vpop.trf.xlu1 }
 0x22e   : > { %549 = vst.msk [vmem:[%s831_s28] sm:$0xff] %vm548_vm3, %v500_v39 }
 0x22f   : > { %v532_v40 = vpop.trf.xlu0 }
 0x230   : > { %565 = vst.msk [vmem:[%s831_s28 + $0x80] sm:$0xff] %vm548_vm3, %v532_v40 }
 0x231   : > { %v501_v41 = vpop.trf.xlu1 }
 0x232   : > { %550 = vst.msk [vmem:[%s831_s28 + $0x8] sm:$0xff] %vm548_vm3, %v501_v41 }
 0x233   : > { %v533_v42 = vpop.trf.xlu0 }
 0x234   : > { %566 = vst.msk [vmem:[%s831_s28 + $0x88] sm:$0xff] %vm548_vm3, %v533_v42 }
 0x235   : > { %v502_v43 = vpop.trf.xlu1 }
 0x236   : > { %551 = vst.msk [vmem:[%s831_s28 + $0x10] sm:$0xff] %vm548_vm3, %v502_v43 }
 0x237   : > { %v534_v44 = vpop.trf.xlu0 }
 0x238   : > { %567 = vst.msk [vmem:[%s831_s28 + $0x90] sm:$0xff] %vm548_vm3, %v534_v44 }
 0x239   : > { %v503_v45 = vpop.trf.xlu1 }
 0x23a   : > { %552 = vst.msk [vmem:[%s831_s28 + $0x18] sm:$0xff] %vm548_vm3, %v503_v45 }
 0x23b   : > { %v535_v46 = vpop.trf.xlu0 }
 0x23c   : > { %568 = vst.msk [vmem:[%s831_s28 + $0x98] sm:$0xff] %vm548_vm3, %v535_v46 }
 0x23d   : > { %v504_v47 = vpop.trf.xlu1 }
 0x23e   : > { %553 = vst.msk [vmem:[%s831_s28 + $0x20] sm:$0xff] %vm548_vm3, %v504_v47 }
 0x23f   : > { %v536_v48 = vpop.trf.xlu0 }
 0x240   : > { %569 = vst.msk [vmem:[%s831_s28 + $0xa0] sm:$0xff] %vm548_vm3, %v536_v48 }
 0x241   : > { %v505_v49 = vpop.trf.xlu1 }
 0x242   : > { %554 = vst.msk [vmem:[%s831_s28 + $0x28] sm:$0xff] %vm548_vm3, %v505_v49 }
 0x243   : > { %v537_v50 = vpop.trf.xlu0 }
 0x244   : > { %570 = vst.msk [vmem:[%s831_s28 + $0xa8] sm:$0xff] %vm548_vm3, %v537_v50 }
 0x245   : > { %v506_v51 = vpop.trf.xlu1 }
 0x246   : > { %555 = vst.msk [vmem:[%s831_s28 + $0x30] sm:$0xff] %vm548_vm3, %v506_v51 }
 0x247   : > { %v538_v52 = vpop.trf.xlu0 }
 0x248   : > { %571 = vst.msk [vmem:[%s831_s28 + $0xb0] sm:$0xff] %vm548_vm3, %v538_v52 }
 0x249   : > { %v507_v53 = vpop.trf.xlu1 }
 0x24a   : > { %556 = vst.msk [vmem:[%s831_s28 + $0x38] sm:$0xff] %vm548_vm3, %v507_v53 }
 0x24b   : > { %v539_v54 = vpop.trf.xlu0 }
 0x24c   : > { %572 = vst.msk [vmem:[%s831_s28 + $0xb8] sm:$0xff] %vm548_vm3, %v539_v54 }
 0x24d   : > { %v508_v55 = vpop.trf.xlu1 }
 0x24e   : > { %557 = vst.msk [vmem:[%s831_s28 + $0x40] sm:$0xff] %vm548_vm3, %v508_v55 }
 0x24f   : > { %v540_v56 = vpop.trf.xlu0 }
 0x250   : > { %573 = vst.msk [vmem:[%s831_s28 + $0xc0] sm:$0xff] %vm548_vm3, %v540_v56 }
 0x251   : > { %v509_v57 = vpop.trf.xlu1 }
 0x252   : > { %558 = vst.msk [vmem:[%s831_s28 + $0x48] sm:$0xff] %vm548_vm3, %v509_v57 }
 0x253   : > { %v541_v58 = vpop.trf.xlu0 }
 0x254   : > { %574 = vst.msk [vmem:[%s831_s28 + $0xc8] sm:$0xff] %vm548_vm3, %v541_v58 }
 0x255   : > { %v510_v59 = vpop.trf.xlu1 }
 0x256   : > { %559 = vst.msk [vmem:[%s831_s28 + $0x50] sm:$0xff] %vm548_vm3, %v510_v59 }
 0x257   : > { %v542_v60 = vpop.trf.xlu0 }
 0x258   : > { %575 = vst.msk [vmem:[%s831_s28 + $0xd0] sm:$0xff] %vm548_vm3, %v542_v60 }
 0x259   : > { %v511_v61 = vpop.trf.xlu1 }
 0x25a   : > { %560 = vst.msk [vmem:[%s831_s28 + $0x58] sm:$0xff] %vm548_vm3, %v511_v61 }
 0x25b   : > { %v543_v62 = vpop.trf.xlu0 }
 0x25c   : > { %576 = vst.msk [vmem:[%s831_s28 + $0xd8] sm:$0xff] %vm548_vm3, %v543_v62 }
 0x25d   : > { %v512_v63 = vpop.trf.xlu1 }
 0x25e   : > { %561 = vst.msk [vmem:[%s831_s28 + $0x60] sm:$0xff] %vm548_vm3, %v512_v63 }
 0x25f   : > { %v544_v0 = vpop.trf.xlu0 }
 0x260   : > { %577 = vst.msk [vmem:[%s831_s28 + $0xe0] sm:$0xff] %vm548_vm3, %v544_v0 }
 0x261   : > { %v513_v1 = vpop.trf.xlu1 }
 0x262   : > { %562 = vst.msk [vmem:[%s831_s28 + $0x68] sm:$0xff] %vm548_vm3, %v513_v1 }
 0x263   : > { %v545_v2 = vpop.trf.xlu0 }
 0x264   : > { %578 = vst.msk [vmem:[%s831_s28 + $0xe8] sm:$0xff] %vm548_vm3, %v545_v2 }
 0x265   : > { %v514_v3 = vpop.trf.xlu1 }
 0x266   : > { %563 = vst.msk [vmem:[%s831_s28 + $0x70] sm:$0xff] %vm548_vm3, %v514_v3 }
 0x267   : > { %v546_v4 = vpop.trf.xlu0 }
 0x268   : > { %579 = vst.msk [vmem:[%s831_s28 + $0xf0] sm:$0xff] %vm548_vm3, %v546_v4 }
 0x269   : > { %v515_v5 = vpop.trf.xlu1 }
 0x26a   : > { %564 = vst.msk [vmem:[%s831_s28 + $0x78] sm:$0xff] %vm548_vm3, %v515_v5 }
 0x26b   : > { %v547_v6 = vpop.trf.xlu0 }
 0x26c   : > { %580 = vst.msk [vmem:[%s831_s28 + $0xf8] sm:$0xff] %vm548_vm3, %v547_v6 }
 0x26d PF: > { %s15_s20 = sadd.s32 1, %s739_s20   ;;  %s912_s18 = smov %s735_s19 }
 0x26e   : > { %p12_p5 = scmp.ge.s32.totalorder %s15_s20, 4   ;;  %s913_s19 = smov %s915_s21 }
 0x270   :  { %14 = sbr.rel (!%p12_p5) target bundleno = 2 (0x2), region = 70 }

</bundles_post_ra>
